<compile_context>
chip_gen: v7x
topology: tpu7x:2x2x1
jax: 0.10.0
libtpu: 0.0.40
codegen_flags: <defaults>
</compile_context>

<pallas_src>
import functools

import jax
import jax.numpy as jnp
from jax.experimental import pallas as pl
from jax.experimental.pallas import tpu as pltpu


def _cycle_loss_kernel(prob_ref, cyc_ref, out_ref, acc_ref, *,
                       eps, initial_cycles, batch, seq_len, tb):
    i = pl.program_id(0)

    @pl.when(i == 0)
    def _init():
        acc_ref[...] = jnp.zeros_like(acc_ref)

    prob = prob_ref[...].astype(jnp.float32)                    # (TB, S)
    tgt_idx = cyc_ref[...].astype(jnp.int32) - initial_cycles   # (TB, 1)

    # target[r, c] = 1 iff c == cycles[r] - initial_cycles.
    # Negative or >= seq_len indices simply never match, which reproduces the
    # PyTorch behavior of leaving those rows all-zero.
    # TODO(synk): logger.warning for negative indices has no numeric effect and is skipped.
    col = jax.lax.broadcasted_iota(jnp.int32, (tb, seq_len), 1)
    target = jnp.where(col == tgt_idx, 1.0, 0.0)

    p = jnp.clip(prob, eps, 1.0 - eps)
    ce = -(target * jnp.log(p) + (1.0 - target) * jnp.log(1.0 - p))
    pt = jnp.where(target == 1.0, p, 1.0 - p)
    focal = jnp.square(1.0 - pt) * ce                           # gamma = 2.0

    # Mask rows of a (possibly padded) last batch tile out of the sum.
    row = jax.lax.broadcasted_iota(jnp.int32, (tb, seq_len), 0) + i * tb
    focal = jnp.where(row < batch, focal, 0.0)

    acc_ref[...] += jnp.sum(focal)

    @pl.when(i == pl.num_programs(0) - 1)
    def _finalize():
        loss = acc_ref[...] * (1.0 / (batch * seq_len))         # mean over B*S
        loss = jnp.where(jnp.isnan(loss) | jnp.isinf(loss), 0.0, loss)
        out_ref[0] = jnp.sum(loss)


def cycle_loss(breakdown_prob, breakdown_cycles, initial_cycles=5, eps=1e-8):
    B, S = breakdown_prob.shape
    cycles = breakdown_cycles.reshape(B, 1).astype(jnp.int32)

    itemsize = jnp.dtype(breakdown_prob.dtype).itemsize
    if B % 8 == 0:
        # Keep one (TB, S) probability tile around ~2 MiB so the 2-deep
        # double-buffered pipeline fits comfortably in v7x scoped VMEM.
        tb = max(8, min(B, (2 << 20) // max(1, S * itemsize)))
        tb = (tb // 8) * 8
    else:
        tb = B  # full-batch block (block dim == array dim is always legal)
    num_blocks = pl.cdiv(B, tb)

    block_bytes = tb * S * itemsize + tb * 4
    vmem_limit = int(min(max(4 * block_bytes + (2 << 20), 4 << 20), 48 << 20))

    kernel = functools.partial(
        _cycle_loss_kernel, eps=float(eps),
        initial_cycles=int(initial_cycles), batch=B, seq_len=S, tb=tb)

    out = pl.pallas_call(
        kernel,
        out_shape=jax.ShapeDtypeStruct((1,), jnp.float32),
        grid_spec=pltpu.PrefetchScalarGridSpec(
            num_scalar_prefetch=0,
            grid=(num_blocks,),
            in_specs=[pl.BlockSpec((tb, S), lambda i: (i, 0)),
                      pl.BlockSpec((tb, 1), lambda i: (i, 0))],
            out_specs=pl.BlockSpec(memory_space=pltpu.MemorySpace.SMEM),
            scratch_shapes=[pltpu.VMEM((1, 1), jnp.float32)]),
        compiler_params=pltpu.CompilerParams(
            dimension_semantics=("arbitrary",),
            vmem_limit_bytes=vmem_limit),
    )(breakdown_prob, cycles)
    return out[0]


def _reference_loss(breakdown_prob, breakdown_cycles, initial_cycles=5,
                    eps=1e-8):
    """Pure-JAX mirror of the PyTorch CycleLoss.forward for correctness."""
    prob = breakdown_prob.astype(jnp.float32)
    B, S = prob.shape
    tgt_idx = breakdown_cycles.astype(jnp.int32)[:, None] - initial_cycles
    col = jnp.arange(S, dtype=jnp.int32)[None, :]
    target = jnp.where(col == tgt_idx, 1.0, 0.0)
    p = jnp.clip(prob, eps, 1.0 - eps)
    ce = -(target * jnp.log(p) + (1.0 - target) * jnp.log(1.0 - p))
    pt = jnp.where(target == 1.0, p, 1.0 - p)
    focal = jnp.square(1.0 - pt) * ce
    loss = jnp.mean(focal)
    return jnp.where(jnp.isnan(loss) | jnp.isinf(loss), 0.0, loss)


if __name__ == "__main__":
    key = jax.random.PRNGKey(0)
    k1, k2 = jax.random.split(key, 2)

    B, S = 8, 16            # batch, sequence length (small test shapes)
    initial_cycles = 5

    breakdown_prob = jax.random.uniform(k1, (B, S), minval=0.01, maxval=0.99)
    # Mix of in-range, below-range and above-range breakdown cycles.
    breakdown_cycles = jax.random.randint(
        k2, (B,), minval=initial_cycles - 2, maxval=initial_cycles + S + 3)

    loss = cycle_loss(breakdown_prob, breakdown_cycles, initial_cycles)
    loss = jax.block_until_ready(loss)

    ref = _reference_loss(breakdown_prob, breakdown_cycles, initial_cycles)
    assert jnp.allclose(loss, ref, rtol=1e-5, atol=1e-6), (loss, ref)

    print("KERNEL_OK")
</pallas_src>

<mosaic_0001>
module attributes {stable_mosaic.version = 11 : i64} {
  func.func @_cycle_loss_kernel(%arg0: i32, %arg1: memref<8x16xf32, #tpu.memory_space<vmem>>, %arg2: memref<8x1xi32, #tpu.memory_space<vmem>>, %arg3: memref<1xf32, #tpu.memory_space<smem>>, %arg4: memref<1x1xf32, #tpu.memory_space<vmem>>) attributes {dimension_semantics = [#tpu.dimension_semantics<arbitrary>], iteration_bounds = array<i64: 1>, scalar_prefetch = 0 : i64, scratch_operands = 1 : i64, tpu.core_type = #tpu.core_type<tc>, window_params = [{transform_indices = @transform_0, window_bounds = array<i64: 8, 16>}, {transform_indices = @transform_1, window_bounds = array<i64: 8, 1>}, {transform_indices = @transform_2, window_bounds = array<i64: 1>}]} {
    %c0_i32 = arith.constant 0 : i32
    %0 = arith.cmpi eq, %arg0, %c0_i32 : i32
    %1 = arith.extui %0 : i1 to i32
    %c0_i32_0 = arith.constant 0 : i32
    %2 = arith.cmpi ne, %1, %c0_i32_0 : i32
    scf.if %2 {
      %cst_22 = arith.constant 0.000000e+00 : f32
      %56 = vector.broadcast %cst_22 : f32 to vector<1x1xf32>
      %c0_23 = arith.constant 0 : index
      %c0_24 = arith.constant 0 : index
      %57 = vector.load %arg4[%c0_23, %c0_24] : memref<1x1xf32, #tpu.memory_space<vmem>>, vector<1x1xf32>
      tpu.vector_store %arg4[%c0_23, %c0_24], %56 {strides = array<i32>} : memref<1x1xf32, #tpu.memory_space<vmem>>, vector<1x1xf32>,
    } else {
    }
    %c0 = arith.constant 0 : index
    %c0_1 = arith.constant 0 : index
    %3 = vector.load %arg1[%c0, %c0_1] : memref<8x16xf32, #tpu.memory_space<vmem>>, vector<8x16xf32>
    %c0_2 = arith.constant 0 : index
    %c0_3 = arith.constant 0 : index
    %4 = vector.load %arg2[%c0_2, %c0_3] : memref<8x1xi32, #tpu.memory_space<vmem>>, vector<8x1xi32>
    %c5_i32 = arith.constant 5 : i32
    %5 = vector.broadcast %c5_i32 : i32 to vector<8x1xi32>
    %6 = arith.subi %4, %5 : vector<8x1xi32>
    %7 = tpu.iota {dimensions = array<i32: 1>} : vector<8x16xi32>
    %8 = vector.broadcast %6 : vector<8x1xi32> to vector<8x16xi32>
    %9 = arith.cmpi eq, %7, %8 : vector<8x16xi32>
    %cst = arith.constant 1.000000e+00 : f32
    %cst_4 = arith.constant 0.000000e+00 : f32
    %10 = vector.broadcast %cst : f32 to vector<8x16xf32>
    %11 = vector.broadcast %cst_4 : f32 to vector<8x16xf32>
    %12 = arith.select %9, %10, %11 : vector<8x16xi1>, vector<8x16xf32>
    %cst_5 = arith.constant 9.99999993E-9 : f32
    %cst_6 = arith.constant 1.000000e+00 : f32
    %13 = vector.broadcast %cst_5 : f32 to vector<8x16xf32>
    %14 = arith.maximumf %13, %3 : vector<8x16xf32>
    %15 = vector.broadcast %cst_6 : f32 to vector<8x16xf32>
    %16 = arith.minimumf %15, %14 : vector<8x16xf32>
    %17 = math.log %16 : vector<8x16xf32>
    %18 = arith.mulf %12, %17 : vector<8x16xf32>
    %cst_7 = arith.constant 1.000000e+00 : f32
    %19 = vector.broadcast %cst_7 : f32 to vector<8x16xf32>
    %20 = arith.subf %19, %12 : vector<8x16xf32>
    %cst_8 = arith.constant 1.000000e+00 : f32
    %21 = vector.broadcast %cst_8 : f32 to vector<8x16xf32>
    %22 = arith.subf %21, %16 : vector<8x16xf32>
    %23 = math.log %22 : vector<8x16xf32>
    %24 = arith.mulf %20, %23 : vector<8x16xf32>
    %25 = arith.addf %18, %24 : vector<8x16xf32>
    %cst_9 = arith.constant 0.000000e+00 : f32
    %26 = vector.broadcast %cst_9 : f32 to vector<8x16xf32>
    %27 = arith.subf %26, %25 : vector<8x16xf32>
    %cst_10 = arith.constant 1.000000e+00 : f32
    %28 = vector.broadcast %cst_10 : f32 to vector<8x16xf32>
    %29 = arith.cmpf oeq, %12, %28 : vector<8x16xf32>
    %cst_11 = arith.constant 1.000000e+00 : f32
    %30 = vector.broadcast %cst_11 : f32 to vector<8x16xf32>
    %31 = arith.subf %30, %16 : vector<8x16xf32>
    %32 = arith.select %29, %16, %31 : vector<8x16xi1>, vector<8x16xf32>
    %cst_12 = arith.constant 1.000000e+00 : f32
    %33 = vector.broadcast %cst_12 : f32 to vector<8x16xf32>
    %34 = arith.subf %33, %32 : vector<8x16xf32>
    %35 = arith.mulf %34, %34 : vector<8x16xf32>
    %36 = arith.mulf %35, %27 : vector<8x16xf32>
    %37 = tpu.iota {dimensions = array<i32: 0>} : vector<8x16xi32>
    %c8_i32 = arith.constant 8 : i32
    %38 = arith.muli %arg0, %c8_i32 : i32
    %39 = vector.broadcast %38 : i32 to vector<8x16xi32>
    %40 = arith.addi %37, %39 : vector<8x16xi32>
    %c8_i32_13 = arith.constant 8 : i32
    %41 = vector.broadcast %c8_i32_13 : i32 to vector<8x16xi32>
    %42 = arith.cmpi slt, %40, %41 : vector<8x16xi32>
    %cst_14 = arith.constant 0.000000e+00 : f32
    %43 = vector.broadcast %cst_14 : f32 to vector<8x16xf32>
    %44 = arith.select %42, %36, %43 : vector<8x16xi1>, vector<8x16xf32>
    %c0_15 = arith.constant 0 : index
    %c0_16 = arith.constant 0 : index
    %45 = vector.load %arg4[%c0_15, %c0_16] : memref<1x1xf32, #tpu.memory_space<vmem>>, vector<1x1xf32>
    %46 = vector.shape_cast %44 : vector<8x16xf32> to vector<1x8x16xf32>
    %cst_17 = arith.constant dense<0.000000e+00> : vector<1xf32>
    %47 = vector.multi_reduction <add>, %46, %cst_17 [1, 2] : vector<1x8x16xf32> to vector<1xf32>
    %48 = vector.shape_cast %47 : vector<1xf32> to vector<1x1x1xf32>
    %49 = vector.extract %48[0, 0, 0] : f32 from vector<1x1x1xf32>
    %50 = vector.broadcast %49 : f32 to vector<1x1xf32>
    %51 = arith.addf %45, %50 : vector<1x1xf32>
    %c0_18 = arith.constant 0 : index
    %c0_19 = arith.constant 0 : index
    %52 = vector.load %arg4[%c0_18, %c0_19] : memref<1x1xf32, #tpu.memory_space<vmem>>, vector<1x1xf32>
    tpu.vector_store %arg4[%c0_18, %c0_19], %51 {strides = array<i32>} : memref<1x1xf32, #tpu.memory_space<vmem>>, vector<1x1xf32>,
    %c0_i32_20 = arith.constant 0 : i32
    %53 = arith.cmpi eq, %arg0, %c0_i32_20 : i32
    %54 = arith.extui %53 : i1 to i32
    %c0_i32_21 = arith.constant 0 : i32
    %55 = arith.cmpi ne, %54, %c0_i32_21 : i32
    scf.if %55 {
      %c0_22 = arith.constant 0 : index
      %c0_23 = arith.constant 0 : index
      %56 = vector.load %arg4[%c0_22, %c0_23] : memref<1x1xf32, #tpu.memory_space<vmem>>, vector<1x1xf32>
      %cst_24 = arith.constant 7.812500e-03 : f32
      %57 = vector.broadcast %cst_24 : f32 to vector<1x1xf32>
      %58 = arith.mulf %56, %57 : vector<1x1xf32>
      %59 = arith.cmpf one, %58, %58 : vector<1x1xf32>
      %60 = math.absf %58 : vector<1x1xf32>
      %cst_25 = arith.constant 0x7F800000 : f32
      %61 = vector.broadcast %cst_25 : f32 to vector<1x1xf32>
      %62 = arith.cmpf oeq, %60, %61 : vector<1x1xf32>
      %63 = arith.ori %59, %62 : vector<1x1xi1>
      %cst_26 = arith.constant 0.000000e+00 : f32
      %64 = vector.broadcast %cst_26 : f32 to vector<1x1xf32>
      %65 = arith.select %63, %64, %58 : vector<1x1xi1>, vector<1x1xf32>
      %66 = vector.shape_cast %65 : vector<1x1xf32> to vector<1x1x1xf32>
      %cst_27 = arith.constant dense<0.000000e+00> : vector<1xf32>
      %67 = vector.multi_reduction <add>, %66, %cst_27 [1, 2] : vector<1x1x1xf32> to vector<1xf32>
      %68 = vector.shape_cast %67 : vector<1xf32> to vector<1x1x1xf32>
      %69 = vector.extract %68[0, 0, 0] : f32 from vector<1x1x1xf32>
      %c0_28 = arith.constant 0 : index
      %70 = memref.load %arg3[%c0_28] : memref<1xf32, #tpu.memory_space<smem>>
      memref.store %69, %arg3[%c0_28] : memref<1xf32, #tpu.memory_space<smem>>
    } else {
    }
    return
  }
  func.func @transform_0(%arg0: i32) -> (i32, i32) {
    %c0_i32 = arith.constant 0 : i32
    %c0_i32_0 = arith.constant 0 : i32
    return %arg0, %c0_i32 : i32, i32
  }
  func.func @transform_1(%arg0: i32) -> (i32, i32) {
    %c0_i32 = arith.constant 0 : i32
    %c0_i32_0 = arith.constant 0 : i32
    return %arg0, %c0_i32 : i32, i32
  }
  func.func @transform_2(%arg0: i32) -> i32 {
    %c0_i32 = arith.constant 0 : i32
    %c0_i32_0 = arith.constant 0 : i32
    return %c0_i32 : i32
  }
}

</mosaic_0001>

<bundles_post_ra>
// kernel: tpu_custom_call.1
= control target key start
LH: loop header
LB: loop body
LE: loop exit
PB: predicated region body
PF: predicated region fallthrough
CT: control target
= control target key end

     0   :  { %s158_s0 = inlined_call_operand.vmem [shape: f32[8,16], index: 0, kind: input, shape index: {}]   ;;  %s159_s1 = inlined_call_operand.vmem [shape: s32[8,1], index: 1, kind: input, shape index: {}]   ;;  %s160_s2 = inlined_call_operand.hbm [shape: f32[1], index: 2, kind: output, shape index: {}]  }
   0x1   :  { %v19_v0 = vld [vmem:[%s159_s1] sm:$0xff] }
   0x2   :  { %7 = vsyncpa [#allocation4], 0  ;;  %v120_v1 = vmov 0   ;;  %v95_v2 = vadd.s32 4294967291, %v19_v0  ;;  %vm16_vm0 = vcmask 0   ;;  %v121_v3 = vmov 0.0  }
   0x3   :  { %103 = vset.pattern.permute.xlu0 %v120_v1  ;;  %17 = vst.msk [vmem:[#allocation2] sm:$0x1] %vm16_vm0, %v121_v3  ;;  %v18_v4 = vld [vmem:[%s158_s0] sm:$0xff]  ;;  %v21_v8 = vlaneseq  ;;  %vm53_vm3 = vcmask 130048   ;;  %s108_s15 = scalar_lea.hbm %s160_s2, 16 }
   0x4   :  { %24 = vperm.xlu0 %103, %v95_v2   ;;  %v28_v5 = vmax.f32 %v18_v4, 1e-08  ;;  %p109_p0 = scmp.ne.s32.totalorder %s160_s2, %s108_s15  ;;  %p112_p1 = scmp.lt.u32.totalorder %s108_s15, %s160_s2 }
   0x5   :  { %v22_v10 = vand.u32 127, %v21_v8 }
   0x6   :  { %v29_v6 = vmin.f32 %v28_v5, 1.0  ;;  %p114_p2 = pnand %p112_p1, %p109_p0 }
   0x8   :  { %v34_v7 = vsub.f32 1.0, %v29_v6  ;;  %104 = vlog2.f32 %v29_v6 }
   0xa   :  { %106 = vlog2.f32 %v34_v7  ;;  %v52_v33 = vld [vmem:[#allocation2] sm:$0x1] }
  0x12   :  { %v105_v9 = vpop.eup %104 }
  0x13   :  { %v31_v13 = vmul.f32 0.6931472, %v105_v9 }
  0x14   :  { %v107_v11 = vpop.eup %106 }
  0x15   :  { %v36_v14 = vmul.f32 0.6931472, %v107_v11 }
  0x83   :  { %v25_v12 = vpop.permute.xlu0 %24 }
  0x84   :  { %vm26_vm1 = vcmp.eq.s32.totalorder %v22_v10, %v25_v12 }
  0x85   :  { %v27_v15 = vsel %vm26_vm1, 1.0, %v121_v3 }
  0x86   :  { %v33_v16 = vsub.f32 1.0, %v27_v15  ;;  %vm40_vm2 = vcmp.eq.f32.partialorder %v27_v15, 1.0  ;;  %v32_v18 = vmul.f32 %v31_v13, %v27_v15 }
  0x87   :  { %v41_v17 = vsel %vm40_vm2, %v29_v6, %v34_v7 }
  0x88   :  { %v37_v19 = vmul.f32 %v36_v14, %v33_v16  ;;  %v42_v20 = vsub.f32 1.0, %v41_v17 }
  0x8a   :  { %v38_v21 = vadd.f32 %v37_v19, %v32_v18  ;;  %v43_v23 = vmul.f32 %v42_v20, %v42_v20 }
  0x8c   :  { %v39_v22 = vsub.f32 0.0, %v38_v21 }
  0x8e   :  { %v44_v24 = vmul.f32 %v43_v23, %v39_v22 }
  0x90   :  { %v54_v25 = vsel %vm53_vm3, %v44_v24, 0.0 }
  0x91   :  { %55 = vadd.xlane.f32.xlu0 %v54_v25 }
 0x11e   :  { %v56_v26 = vpop.xlane.xlu0 %55 }
 0x11f   :  { %v57_v27 = vrot.slane %v56_v26, 4 }
 0x121   :  { %v58_v28 = vadd.f32 %v57_v27, %v56_v26 }
 0x123   :  { %v59_v29 = vrot.slane %v58_v28, 2 }
 0x125   :  { %v60_v30 = vadd.f32 %v59_v29, %v58_v28 }
 0x127   :  { %v61_v31 = vrot.slane %v60_v30, 1 }
 0x129   :  { %v62_v32 = vadd.f32 %v61_v31, %v60_v30 }
 0x12b   :  { %96 = vpush %v62_v32 }
 0x15c   :  { %s97_s0 = spop %96 }
 0x15d   :  { %v64_v34 = vstv %s97_s0 }
 0x15e   :  { %v65_v35 = vadd.f32 %v64_v34, %v52_v33 }
 0x160   :  { %67 = vst.msk [vmem:[#allocation2] sm:$0x1] %vm16_vm0, %v65_v35 }
 0x167   :  { %v71_v36 = vld [vmem:[#allocation2] sm:$0x1] }
 0x168   :  { %v72_v37 = vmul.f32 0.0078125, %v71_v36 }
 0x16a   :  { %v74_v38 = vand.u32 2147483647, %v72_v37  ;;  %vm73_vm4 = vcmp.ne.f32.partialorder %v72_v37, %v72_v37 }
 0x16c   :  { %vm75_vm5 = vcmp.eq.f32.partialorder %v74_v38, inf }
 0x16d   :  { %vm76_vm6 = vmor %vm73_vm4, %vm75_vm5 }
 0x16e   :  { %v77_v39 = vsel %vm76_vm6, 0.0, %v72_v37 }
 0x16f   :  { %98 = vpush %v77_v39 }
 0x1a0   :  { %s99_s1 = spop %98 }
 0x1a1   :  { %81 = sst [smem:[#allocation3]] %s99_s1 }
 0x1a2   :  { %117 = shalt.err (!%p114_p2)
}
 0x1a3   :  { %s122_s20 = smov [#allocation3]  }
 0x1a4   :  { %89 = dma.smem_to_hbm %s122_s20, 16, %s160_s2, [#allocation4]  }
 0x1a5   :  { %118 = dma.done.wait [#allocation4], 16  }
 0x1a6   :  { %119 = vsyncadd [#allocation4], 4294967280 }
 0x1a7   :  { %93 = sfence }
 0x1a8   :  { %94 = vsyncpa [#allocation4], 1 }

</bundles_post_ra>
